<compile_context>
chip_gen: v7x
topology: tpu7x:2x2x1
jax: 0.10.0
libtpu: 0.0.40
codegen_flags: <defaults>
</compile_context>

<pallas_src>
import functools

import jax
import jax.numpy as jnp
from jax import lax
from jax.experimental import pallas as pl
from jax.experimental.pallas import tpu as pltpu


# ---------------------------------------------------------------------------
# Kernel
# ---------------------------------------------------------------------------
def generator_kernel(
    x_ref,      # (TM, Din) f32   batch tile of inputs
    tgt_ref,    # (TM, 1)   f32   batch tile of sentiment targets
    w_ref,      # (Rpad, H) bf16  packed weights (resident across grid steps)
    b_ref,      # (8, H)    f32   packed biases  (resident across grid steps)
    out_ref,    # (8, 128)  f32   per-tile partial losses (lanes 0..2 of row 0)
    *, din, hidden, inv_b, inv_bh,
):
    H = hidden

    # Cast activations to bf16 on the VPU (inputs stay f32 in HBM).
    xb = x_ref[...].astype(jnp.bfloat16)                           # (TM, Din)

    # enc_out = tanh(encoder(x)); .detach() is autograd-only -> no-op here.
    enc = jnp.tanh(
        jnp.dot(xb, w_ref[0:din, :], preferred_element_type=jnp.float32)
        + b_ref[0:1, :]
    )                                                              # (TM, H) f32

    # fake = tanh(ab(enc_out))
    fake = jnp.tanh(
        jnp.dot(enc.astype(jnp.bfloat16), w_ref[din:din + H, :],
                preferred_element_type=jnp.float32)
        + b_ref[1:2, :]
    )                                                              # (TM, H) f32

    # rebuild = tanh(ba(fake))
    rebuild = jnp.tanh(
        jnp.dot(fake.astype(jnp.bfloat16), w_ref[din + H:din + 2 * H, :],
                preferred_element_type=jnp.float32)
        + b_ref[2:3, :]
    )                                                              # (TM, H) f32

    # Discriminator heads: N=1 matmuls are wasteful on the MXU, so compute them
    # as VPU elementwise multiplies + XLU lane reductions (idle slots).
    w_sd = w_ref[din + 2 * H:din + 2 * H + 1, :].astype(jnp.float32)   # (1, H)
    w_fd = w_ref[din + 2 * H + 1:din + 2 * H + 2, :].astype(jnp.float32)
    z_s = jnp.sum(fake * w_sd, axis=1, keepdims=True) + b_ref[3:4, 0:1]  # (TM, 1)
    z_f = jnp.sum(fake * w_fd, axis=1, keepdims=True) + b_ref[3:4, 1:2]  # (TM, 1)

    t = tgt_ref[...].astype(jnp.float32)                           # (TM, 1)

    # Stable logits-based BCE (== BCE(sigmoid(z), t)), partial SUMS, pre-scaled
    # by the global 1/B (1/(B*H) for L1) so the wrapper only has to sum tiles.
    sent_sum = jnp.sum(
        jnp.maximum(z_s, 0.0) - z_s * t + jnp.log1p(jnp.exp(-jnp.abs(z_s))))
    # target == 1  =>  BCE = softplus(-z)
    fake_sum = jnp.sum(
        jnp.maximum(-z_f, 0.0) + jnp.log1p(jnp.exp(-jnp.abs(z_f))))
    rebuild_sum = jnp.sum(jnp.abs(rebuild - enc))

    lane = lax.broadcasted_iota(jnp.int32, (8, 128), 1)
    sub = lax.broadcasted_iota(jnp.int32, (8, 128), 0)
    vals = jnp.where(lane == 0, sent_sum * inv_b,
           jnp.where(lane == 1, fake_sum * inv_b,
           jnp.where(lane == 2, rebuild_sum * inv_bh, 0.0)))
    out_ref[...] = jnp.where(sub == 0, vals, 0.0)


# ---------------------------------------------------------------------------
# Wrapper
# ---------------------------------------------------------------------------
def _pick_tile_m(batch, cap=128):
    for tm in (512, 256, 128, 64, 32, 16, 8):
        if tm <= min(batch, cap) and batch % tm == 0:
            return tm
    return batch  # small / odd batch: single full-batch tile


def generator_forward(x, tgt, packed, *, tile_m=128):
    """Returns (sent_loss, fake_loss, rebuild_loss), each shape (1,) f32."""
    B, din = x.shape
    H = packed["hidden"]
    assert packed["din"] == din
    w_slab = packed["w_slab"]
    b_slab = packed["b_slab"]
    R = w_slab.shape[0]

    TM = _pick_tile_m(B, tile_m)
    num_tiles = B // TM

    kernel = functools.partial(
        generator_kernel, din=din, hidden=H,
        inv_b=1.0 / B, inv_bh=1.0 / (B * H))

    flops = 2 * B * H * (din + 2 * H + 2)
    transcendentals = 3 * B * H + 4 * B
    bytes_accessed = int(
        x.size * x.dtype.itemsize + tgt.size * tgt.dtype.itemsize
        + w_slab.size * 2 + b_slab.size * 4 + num_tiles * 8 * 128 * 4)

    # Weights/biases resident + double-buffered activation tiles, with margin.
    # Capped well below v7x's 64 MiB physical VMEM (v5e/v6e have 128 MiB).
    vmem_need = (2 * (w_slab.size * 2 + b_slab.size * 4
                      + TM * din * 4 + TM * 4 + 8 * 128 * 4)
                 + 6 * TM * H * 4 + (2 << 20))
    vmem_limit = int(min(max(vmem_need, 16 << 20), 40 << 20))
    # TODO(synk): once H is large enough that the resident weight slab nears
    # ~30 MB, add a K/N grid over w_slab instead of keeping it whole-resident
    # (v7x has 64 MiB physical VMEM vs 128 MiB on v5e/v6e).

    partials = pl.pallas_call(
        kernel,
        out_shape=jax.ShapeDtypeStruct((num_tiles * 8, 128), jnp.float32),
        grid_spec=pltpu.PrefetchScalarGridSpec(
            num_scalar_prefetch=0,
            grid=(num_tiles,),
            in_specs=[
                pl.BlockSpec((TM, din), lambda i: (i, 0)),   # x batch tile
                pl.BlockSpec((TM, 1), lambda i: (i, 0)),     # tgt batch tile
                pl.BlockSpec((R, H), lambda i: (0, 0)),      # weights, resident
                pl.BlockSpec((8, H), lambda i: (0, 0)),      # biases, resident
            ],
            out_specs=pl.BlockSpec((8, 128), lambda i: (i, 0)),
        ),
        compiler_params=pltpu.CompilerParams(
            dimension_semantics=("parallel",),
            vmem_limit_bytes=vmem_limit,
        ),
        cost_estimate=pl.CostEstimate(
            flops=flops,
            transcendentals=transcendentals,
            bytes_accessed=bytes_accessed,
        ),
    )(x, tgt, w_slab, b_slab)

    totals = jnp.sum(partials, axis=0)              # (128,) — only lanes 0..2 used
    return totals[0:1], totals[1:2], totals[2:3]


# ---------------------------------------------------------------------------
# Parameter construction / packing
# ---------------------------------------------------------------------------
def init_params(key, din, hidden):
    """Deterministic xavier-ish init of the five sub-modules (raw, unpacked)."""
    ks = jax.random.split(key, 5)

    def dense(k, fan_in, fan_out):
        scale = jnp.sqrt(2.0 / (fan_in + fan_out)).astype(jnp.float32)
        w = jax.random.normal(k, (fan_in, fan_out), jnp.float32) * scale
        b = jnp.zeros((fan_out,), jnp.float32)
        return w, b

    w_enc, b_enc = dense(ks[0], din, hidden)
    w_ab, b_ab = dense(ks[1], hidden, hidden)
    w_ba, b_ba = dense(ks[2], hidden, hidden)
    w_sd, b_sd = dense(ks[3], hidden, 1)
    w_fd, b_fd = dense(ks[4], hidden, 1)
    return dict(w_enc=w_enc, b_enc=b_enc, w_ab=w_ab, b_ab=b_ab,
                w_ba=w_ba, b_ba=b_ba, w_sd=w_sd, b_sd=b_sd,
                w_fd=w_fd, b_fd=b_fd)


def pack_params(p, din, hidden):
    """Pack all weights into one bf16 slab and all biases into one f32 slab."""
    H = hidden
    rows = din + 2 * H + 2
    rows_pad = ((rows + 7) // 8) * 8

    w_slab = jnp.zeros((rows_pad, H), jnp.float32)
    w_slab = w_slab.at[0:din, :].set(p["w_enc"])
    w_slab = w_slab.at[din:din + H, :].set(p["w_ab"])
    w_slab = w_slab.at[din + H:din + 2 * H, :].set(p["w_ba"])
    w_slab = w_slab.at[din + 2 * H, :].set(p["w_sd"][:, 0])
    w_slab = w_slab.at[din + 2 * H + 1, :].set(p["w_fd"][:, 0])

    b_slab = jnp.zeros((8, H), jnp.float32)
    b_slab = b_slab.at[0, :].set(p["b_enc"])
    b_slab = b_slab.at[1, :].set(p["b_ab"])
    b_slab = b_slab.at[2, :].set(p["b_ba"])
    b_slab = b_slab.at[3, 0].set(p["b_sd"][0])
    b_slab = b_slab.at[3, 1].set(p["b_fd"][0])

    return dict(w_slab=w_slab.astype(jnp.bfloat16),  # bf16 weights, f32 biases
                b_slab=b_slab, din=din, hidden=hidden)


# ---------------------------------------------------------------------------
# Pure-JAX references
# ---------------------------------------------------------------------------
def reference_forward(x, tgt, packed):
    """Reference of the identical (packed, bf16-matmul) forward."""
    H, din = packed["hidden"], packed["din"]
    w, b = packed["w_slab"], packed["b_slab"]
    xb = x.astype(jnp.bfloat16)
    enc = jnp.tanh(jnp.dot(xb, w[0:din, :],
                           preferred_element_type=jnp.float32) + b[0:1, :])
    fake = jnp.tanh(jnp.dot(enc.astype(jnp.bfloat16), w[din:din + H, :],
                            preferred_element_type=jnp.float32) + b[1:2, :])
    rebuild = jnp.tanh(jnp.dot(fake.astype(jnp.bfloat16), w[din + H:din + 2 * H, :],
                               preferred_element_type=jnp.float32) + b[2:3, :])
    w_sd = w[din + 2 * H:din + 2 * H + 1, :].astype(jnp.float32)
    w_fd = w[din + 2 * H + 1:din + 2 * H + 2, :].astype(jnp.float32)
    z_s = jnp.sum(fake * w_sd, axis=1, keepdims=True) + b[3, 0]
    z_f = jnp.sum(fake * w_fd, axis=1, keepdims=True) + b[3, 1]
    sent = jnp.mean(jnp.maximum(z_s, 0.0) - z_s * tgt
                    + jnp.log1p(jnp.exp(-jnp.abs(z_s))))
    fake_l = jnp.mean(jnp.maximum(-z_f, 0.0) + jnp.log1p(jnp.exp(-jnp.abs(z_f))))
    rebuild_l = jnp.mean(jnp.abs(rebuild - enc))
    return sent, fake_l, rebuild_l


def reference_forward_f32(x, tgt, p):
    """Full-precision (f32-weight) reference of the original module."""
    enc = jnp.tanh(x @ p["w_enc"] + p["b_enc"])
    fake = jnp.tanh(enc @ p["w_ab"] + p["b_ab"])
    rebuild = jnp.tanh(fake @ p["w_ba"] + p["b_ba"])
    z_s = fake @ p["w_sd"] + p["b_sd"]
    z_f = fake @ p["w_fd"] + p["b_fd"]
    sent = jnp.mean(jnp.maximum(z_s, 0.0) - z_s * tgt
                    + jnp.log1p(jnp.exp(-jnp.abs(z_s))))
    fake_l = jnp.mean(jnp.maximum(-z_f, 0.0) + jnp.log1p(jnp.exp(-jnp.abs(z_f))))
    rebuild_l = jnp.mean(jnp.abs(rebuild - enc))
    return sent, fake_l, rebuild_l


# ---------------------------------------------------------------------------
if __name__ == "__main__":
    B, DIN, HIDDEN = 64, 128, 128

    key = jax.random.PRNGKey(0)
    k_x, k_t, k_p = jax.random.split(key, 3)

    x = jax.random.normal(k_x, (B, DIN), jnp.float32)
    # binary sentiment targets, as float (tgt.float() in the PyTorch code)
    tgt = jax.random.bernoulli(k_t, 0.5, (B, 1)).astype(jnp.float32)

    raw_params = init_params(k_p, DIN, HIDDEN)
    packed = pack_params(raw_params, DIN, HIDDEN)

    # tile_m=32 -> grid of 2 batch tiles (exercises the grid / weight residency)
    sent_loss, fake_loss, rebuild_loss = generator_forward(x, tgt, packed, tile_m=32)
    jax.block_until_ready((sent_loss, fake_loss, rebuild_loss))

    assert sent_loss.shape == (1,) and fake_loss.shape == (1,) \
        and rebuild_loss.shape == (1,)

    # Exact check vs a pure-JAX reference of the same (packed, bf16) compute.
    r_sent, r_fake, r_rebuild = reference_forward(x, tgt, packed)
    assert jnp.allclose(sent_loss[0], r_sent, atol=1e-4, rtol=1e-3)
    assert jnp.allclose(fake_loss[0], r_fake, atol=1e-4, rtol=1e-3)
    assert jnp.allclose(rebuild_loss[0], r_rebuild, atol=1e-4, rtol=1e-3)

    # Loose check vs the original f32 model (bounds bf16-weight drift).
    f_sent, f_fake, f_rebuild = reference_forward_f32(x, tgt, raw_params)
    assert jnp.allclose(sent_loss[0], f_sent, atol=1e-1)
    assert jnp.allclose(fake_loss[0], f_fake, atol=1e-1)
    assert jnp.allclose(rebuild_loss[0], f_rebuild, atol=1e-1)

    print("KERNEL_OK")
</pallas_src>

<mosaic_0001>
module attributes {stable_mosaic.version = 11 : i64} {
  func.func @generator_kernel(%arg0: i32, %arg1: memref<32x128xf32, #tpu.memory_space<vmem>>, %arg2: memref<32x1xf32, #tpu.memory_space<vmem>>, %arg3: memref<392x128xbf16, #tpu.memory_space<vmem>>, %arg4: memref<8x128xf32, #tpu.memory_space<vmem>>, %arg5: memref<8x128xf32, #tpu.memory_space<vmem>>) attributes {dimension_semantics = [#tpu.dimension_semantics<parallel>], iteration_bounds = array<i64: 2>, scalar_prefetch = 0 : i64, scratch_operands = 0 : i64, tpu.core_type = #tpu.core_type<tc>, window_params = [{transform_indices = @transform_0, window_bounds = array<i64: 32, 128>}, {transform_indices = @transform_1, window_bounds = array<i64: 32, 1>}, {pipeline_mode = #tpu.pipeline_mode<synchronous>, transform_indices = @transform_2, window_bounds = array<i64: 392, 128>}, {pipeline_mode = #tpu.pipeline_mode<synchronous>, transform_indices = @transform_3, window_bounds = array<i64: 8, 128>}, {transform_indices = @transform_4, window_bounds = array<i64: 8, 128>}]} {
    %c0 = arith.constant 0 : index
    %c0_0 = arith.constant 0 : index
    %0 = vector.load %arg1[%c0, %c0_0] : memref<32x128xf32, #tpu.memory_space<vmem>>, vector<32x128xf32>
    %1 = arith.truncf %0 : vector<32x128xf32> to vector<32x128xbf16>
    %c0_1 = arith.constant 0 : index
    %c0_2 = arith.constant 0 : index
    %2 = vector.load %arg3[%c0_1, %c0_2] : memref<392x128xbf16, #tpu.memory_space<vmem>>, vector<128x128xbf16>
    %cst = arith.constant dense<0.000000e+00> : vector<32x128xf32>
    %3 = tpu.matmul %1, %2, %cst {dimension_numbers = #tpu.dot_dimension_numbers<[1], [0], [0], [1], [0, 0, 1, 1], [], []>} : vector<32x128xbf16>, vector<128x128xbf16>, vector<32x128xf32> -> vector<32x128xf32>
    %c0_3 = arith.constant 0 : index
    %c0_4 = arith.constant 0 : index
    %4 = vector.load %arg4[%c0_3, %c0_4] : memref<8x128xf32, #tpu.memory_space<vmem>>, vector<1x128xf32>
    %5 = vector.broadcast %4 : vector<1x128xf32> to vector<32x128xf32>
    %6 = arith.addf %3, %5 : vector<32x128xf32>
    %7 = math.tanh %6 : vector<32x128xf32>
    %8 = arith.truncf %7 : vector<32x128xf32> to vector<32x128xbf16>
    %c128 = arith.constant 128 : index
    %c0_5 = arith.constant 0 : index
    %9 = vector.load %arg3[%c128, %c0_5] : memref<392x128xbf16, #tpu.memory_space<vmem>>, vector<128x128xbf16>
    %cst_6 = arith.constant dense<0.000000e+00> : vector<32x128xf32>
    %10 = tpu.matmul %8, %9, %cst_6 {dimension_numbers = #tpu.dot_dimension_numbers<[1], [0], [0], [1], [0, 0, 1, 1], [], []>} : vector<32x128xbf16>, vector<128x128xbf16>, vector<32x128xf32> -> vector<32x128xf32>
    %c1 = arith.constant 1 : index
    %c0_7 = arith.constant 0 : index
    %11 = vector.load %arg4[%c1, %c0_7] : memref<8x128xf32, #tpu.memory_space<vmem>>, vector<1x128xf32>
    %12 = vector.broadcast %11 : vector<1x128xf32> to vector<32x128xf32>
    %13 = arith.addf %10, %12 : vector<32x128xf32>
    %14 = math.tanh %13 : vector<32x128xf32>
    %15 = arith.truncf %14 : vector<32x128xf32> to vector<32x128xbf16>
    %c256 = arith.constant 256 : index
    %c0_8 = arith.constant 0 : index
    %16 = vector.load %arg3[%c256, %c0_8] : memref<392x128xbf16, #tpu.memory_space<vmem>>, vector<128x128xbf16>
    %cst_9 = arith.constant dense<0.000000e+00> : vector<32x128xf32>
    %17 = tpu.matmul %15, %16, %cst_9 {dimension_numbers = #tpu.dot_dimension_numbers<[1], [0], [0], [1], [0, 0, 1, 1], [], []>} : vector<32x128xbf16>, vector<128x128xbf16>, vector<32x128xf32> -> vector<32x128xf32>
    %c2 = arith.constant 2 : index
    %c0_10 = arith.constant 0 : index
    %18 = vector.load %arg4[%c2, %c0_10] : memref<8x128xf32, #tpu.memory_space<vmem>>, vector<1x128xf32>
    %19 = vector.broadcast %18 : vector<1x128xf32> to vector<32x128xf32>
    %20 = arith.addf %17, %19 : vector<32x128xf32>
    %21 = math.tanh %20 : vector<32x128xf32>
    %c384 = arith.constant 384 : index
    %c0_11 = arith.constant 0 : index
    %22 = vector.load %arg3[%c384, %c0_11] : memref<392x128xbf16, #tpu.memory_space<vmem>>, vector<1x128xbf16>
    %23 = arith.extf %22 : vector<1x128xbf16> to vector<1x128xf32>
    %c385 = arith.constant 385 : index
    %c0_12 = arith.constant 0 : index
    %24 = vector.load %arg3[%c385, %c0_12] : memref<392x128xbf16, #tpu.memory_space<vmem>>, vector<1x128xbf16>
    %25 = arith.extf %24 : vector<1x128xbf16> to vector<1x128xf32>
    %26 = vector.broadcast %23 : vector<1x128xf32> to vector<32x128xf32>
    %27 = arith.mulf %14, %26 : vector<32x128xf32>
    %cst_13 = arith.constant dense<0.000000e+00> : vector<32xf32>
    %28 = vector.multi_reduction <add>, %27, %cst_13 [1] : vector<32x128xf32> to vector<32xf32>
    %29 = vector.shape_cast %28 : vector<32xf32> to vector<32x1xf32>
    %c3 = arith.constant 3 : index
    %c0_14 = arith.constant 0 : index
    %30 = vector.load %arg4[%c3, %c0_14] : memref<8x128xf32, #tpu.memory_space<vmem>>, vector<1x1xf32>
    %31 = vector.broadcast %30 : vector<1x1xf32> to vector<32x1xf32>
    %32 = arith.addf %29, %31 : vector<32x1xf32>
    %33 = vector.broadcast %25 : vector<1x128xf32> to vector<32x128xf32>
    %34 = arith.mulf %14, %33 : vector<32x128xf32>
    %cst_15 = arith.constant dense<0.000000e+00> : vector<32xf32>
    %35 = vector.multi_reduction <add>, %34, %cst_15 [1] : vector<32x128xf32> to vector<32xf32>
    %36 = vector.shape_cast %35 : vector<32xf32> to vector<32x1xf32>
    %c3_16 = arith.constant 3 : index
    %c1_17 = arith.constant 1 : index
    %37 = vector.load %arg4[%c3_16, %c1_17] : memref<8x128xf32, #tpu.memory_space<vmem>>, vector<1x1xf32>
    %38 = vector.broadcast %37 : vector<1x1xf32> to vector<32x1xf32>
    %39 = arith.addf %36, %38 : vector<32x1xf32>
    %c0_18 = arith.constant 0 : index
    %c0_19 = arith.constant 0 : index
    %40 = vector.load %arg2[%c0_18, %c0_19] : memref<32x1xf32, #tpu.memory_space<vmem>>, vector<32x1xf32>
    %cst_20 = arith.constant 0.000000e+00 : f32
    %41 = vector.broadcast %cst_20 : f32 to vector<32x1xf32>
    %42 = arith.maximumf %32, %41 : vector<32x1xf32>
    %43 = arith.mulf %32, %40 : vector<32x1xf32>
    %44 = arith.subf %42, %43 : vector<32x1xf32>
    %45 = math.absf %32 : vector<32x1xf32>
    %cst_21 = arith.constant 0.000000e+00 : f32
    %46 = vector.broadcast %cst_21 : f32 to vector<32x1xf32>
    %47 = arith.subf %46, %45 : vector<32x1xf32>
    %48 = math.exp %47 : vector<32x1xf32>
    %49 = math.log1p %48 : vector<32x1xf32>
    %50 = arith.addf %44, %49 : vector<32x1xf32>
    %51 = vector.shape_cast %50 : vector<32x1xf32> to vector<1x32x1xf32>
    %cst_22 = arith.constant dense<0.000000e+00> : vector<1xf32>
    %52 = vector.multi_reduction <add>, %51, %cst_22 [1, 2] : vector<1x32x1xf32> to vector<1xf32>
    %53 = vector.shape_cast %52 : vector<1xf32> to vector<1x1x1xf32>
    %54 = vector.extract %53[0, 0, 0] : f32 from vector<1x1x1xf32>
    %cst_23 = arith.constant 0.000000e+00 : f32
    %55 = vector.broadcast %cst_23 : f32 to vector<32x1xf32>
    %56 = arith.subf %55, %39 : vector<32x1xf32>
    %cst_24 = arith.constant 0.000000e+00 : f32
    %57 = vector.broadcast %cst_24 : f32 to vector<32x1xf32>
    %58 = arith.maximumf %56, %57 : vector<32x1xf32>
    %59 = math.absf %39 : vector<32x1xf32>
    %cst_25 = arith.constant 0.000000e+00 : f32
    %60 = vector.broadcast %cst_25 : f32 to vector<32x1xf32>
    %61 = arith.subf %60, %59 : vector<32x1xf32>
    %62 = math.exp %61 : vector<32x1xf32>
    %63 = math.log1p %62 : vector<32x1xf32>
    %64 = arith.addf %58, %63 : vector<32x1xf32>
    %65 = vector.shape_cast %64 : vector<32x1xf32> to vector<1x32x1xf32>
    %cst_26 = arith.constant dense<0.000000e+00> : vector<1xf32>
    %66 = vector.multi_reduction <add>, %65, %cst_26 [1, 2] : vector<1x32x1xf32> to vector<1xf32>
    %67 = vector.shape_cast %66 : vector<1xf32> to vector<1x1x1xf32>
    %68 = vector.extract %67[0, 0, 0] : f32 from vector<1x1x1xf32>
    %69 = arith.subf %21, %7 : vector<32x128xf32>
    %70 = math.absf %69 : vector<32x128xf32>
    %71 = vector.shape_cast %70 : vector<32x128xf32> to vector<1x32x128xf32>
    %cst_27 = arith.constant dense<0.000000e+00> : vector<1xf32>
    %72 = vector.multi_reduction <add>, %71, %cst_27 [1, 2] : vector<1x32x128xf32> to vector<1xf32>
    %73 = vector.shape_cast %72 : vector<1xf32> to vector<1x1x1xf32>
    %74 = vector.extract %73[0, 0, 0] : f32 from vector<1x1x1xf32>
    %75 = tpu.iota {dimensions = array<i32: 1>} : vector<8x128xi32>
    %76 = tpu.iota {dimensions = array<i32: 0>} : vector<8x128xi32>
    %c0_i32 = arith.constant 0 : i32
    %77 = vector.broadcast %c0_i32 : i32 to vector<8x128xi32>
    %78 = arith.cmpi eq, %75, %77 : vector<8x128xi32>
    %cst_28 = arith.constant 1.562500e-02 : f32
    %79 = arith.mulf %54, %cst_28 : f32
    %c1_i32 = arith.constant 1 : i32
    %80 = vector.broadcast %c1_i32 : i32 to vector<8x128xi32>
    %81 = arith.cmpi eq, %75, %80 : vector<8x128xi32>
    %cst_29 = arith.constant 1.562500e-02 : f32
    %82 = arith.mulf %68, %cst_29 : f32
    %c2_i32 = arith.constant 2 : i32
    %83 = vector.broadcast %c2_i32 : i32 to vector<8x128xi32>
    %84 = arith.cmpi eq, %75, %83 : vector<8x128xi32>
    %cst_30 = arith.constant 1.22070313E-4 : f32
    %85 = arith.mulf %74, %cst_30 : f32
    %cst_31 = arith.constant 0.000000e+00 : f32
    %86 = vector.broadcast %85 : f32 to vector<8x128xf32>
    %87 = vector.broadcast %cst_31 : f32 to vector<8x128xf32>
    %88 = arith.select %84, %86, %87 : vector<8x128xi1>, vector<8x128xf32>
    %89 = vector.broadcast %82 : f32 to vector<8x128xf32>
    %90 = arith.select %81, %89, %88 : vector<8x128xi1>, vector<8x128xf32>
    %91 = vector.broadcast %79 : f32 to vector<8x128xf32>
    %92 = arith.select %78, %91, %90 : vector<8x128xi1>, vector<8x128xf32>
    %c0_i32_32 = arith.constant 0 : i32
    %93 = vector.broadcast %c0_i32_32 : i32 to vector<8x128xi32>
    %94 = arith.cmpi eq, %76, %93 : vector<8x128xi32>
    %cst_33 = arith.constant 0.000000e+00 : f32
    %95 = vector.broadcast %cst_33 : f32 to vector<8x128xf32>
    %96 = arith.select %94, %92, %95 : vector<8x128xi1>, vector<8x128xf32>
    %c0_34 = arith.constant 0 : index
    %c0_35 = arith.constant 0 : index
    %97 = vector.load %arg5[%c0_34, %c0_35] : memref<8x128xf32, #tpu.memory_space<vmem>>, vector<8x128xf32>
    tpu.vector_store %arg5[%c0_34, %c0_35], %96 {strides = array<i32>} : memref<8x128xf32, #tpu.memory_space<vmem>>, vector<8x128xf32>,
    return
  }
  func.func @transform_0(%arg0: i32) -> (i32, i32) {
    %c0_i32 = arith.constant 0 : i32
    %c0_i32_0 = arith.constant 0 : i32
    return %arg0, %c0_i32 : i32, i32
  }
  func.func @transform_1(%arg0: i32) -> (i32, i32) {
    %c0_i32 = arith.constant 0 : i32
    %c0_i32_0 = arith.constant 0 : i32
    return %arg0, %c0_i32 : i32, i32
  }
  func.func @transform_2(%arg0: i32) -> (i32, i32) {
    %c0_i32 = arith.constant 0 : i32
    %c0_i32_0 = arith.constant 0 : i32
    %c0_i32_1 = arith.constant 0 : i32
    return %c0_i32, %c0_i32_0 : i32, i32
  }
  func.func @transform_3(%arg0: i32) -> (i32, i32) {
    %c0_i32 = arith.constant 0 : i32
    %c0_i32_0 = arith.constant 0 : i32
    %c0_i32_1 = arith.constant 0 : i32
    return %c0_i32, %c0_i32_0 : i32, i32
  }
  func.func @transform_4(%arg0: i32) -> (i32, i32) {
    %c0_i32 = arith.constant 0 : i32
    %c0_i32_0 = arith.constant 0 : i32
    return %arg0, %c0_i32 : i32, i32
  }
}

</mosaic_0001>

<bundles_post_ra>
// kernel: tpu_custom_call.1
= control target key start
LH: loop header
LB: loop body
LE: loop exit
PB: predicated region body
PF: predicated region fallthrough
CT: control target
= control target key end

     0   :  { %9 = vsyncpa [#allocation3], 0  ;;  %s1643_s0 = inlined_call_operand.vmem [shape: f32[64,128], index: 0, kind: input, shape index: {}]   ;;  %s1644_s1 = inlined_call_operand.vmem [shape: f32[64,1], index: 1, kind: input, shape index: {}]   ;;  %s1645_s2 = inlined_call_operand.hbm [shape: bf16[392,128], index: 2, kind: input, shape index: {}]   ;;  %s1646_s3 = inlined_call_operand.vmem [shape: f32[8,128], index: 3, kind: input, shape index: {}]   ;;  %s1647_s4 = inlined_call_operand.hbm [shape: f32[16,128], index: 4, kind: output, shape index: {}]  }
   0x1   :  { %10 = vsyncpa [#allocation4], 0 }
   0x2   :  { %12 = vsyncpa [#allocation4 + $0x1], 0  ;;  %s1378_s15 = smov 0   ;;  %s1380_s16 = smov 0  }
   0x3   :  { %s1382_s17 = smov 0   ;;  %s1384_s18 = smov 0  }
   0x4 LB: > { %s1399_s19 = sadd.s32 4294967295, %s1346_s18   ;;  %s980_s20 = sadd.s32 4294967294, %s1346_s18   ;;  %s1346_s18 = sphi %s1384_s18, %s1663_s18   ;;  %s1342_s17 = sphi %s1382_s17, %s1662_s17   ;;  %s1338_s16 = sphi %s1380_s16, %s1661_s16   ;;  %s1334_s15 = sphi %s1378_s15, %s1660_s15  }
   0x5   : > { %s1403_s21 = sadd.s32 1, %s1346_s18   ;;  %s119_s22 = sadd.s32 1, %s1342_s17 }
   0x6   : > { %s116_s23 = ssub.s32 %s1346_s18, %s1403_s21  ;;  %p129_p0 = scmp.ne.s32.totalorder %s1342_s17, %s1338_s16 }
   0x7   : > { %p117_p1 = scmp.eq.s32.totalorder %s116_s23, 0  ;;  %p130_p2 = scmp.eq.s32.totalorder %s1399_s19, 1 }
   0x8   : > { %p135_p3 = scmp.ne.s32.totalorder %s1338_s16, %s1334_s15  ;;  %p136_p4 = scmp.eq.s32.totalorder %s980_s20, 1 }
   0x9   : > { %s1414_s24 = scalar_select %p117_p1, %s1342_s17, %s119_s22  }
   0xa   : > { %p1416_p5 = por %p130_p2, %p129_p0  ;;  %p1420_p6 = por %p136_p4, %p135_p3 }
   0xb   : > { %p981_p7 = scmp.ge.s32.totalorder %s1346_s18, 1  ;;  %p143_p8 = scmp.lt.s32.totalorder %s1346_s18, 3 }
   0xc   : > { %s1651_s25 = scalar_select %p1416_p5, 1, 0 }
   0xd   : > { %s1652_s26 = scalar_select %p1420_p6, 1, 0 }
   0xe   : > { %p1648_p9 = scmp.eq.s32.totalorder %s1399_s19, 0  ;;  %p1427_p10 = pnand %p981_p7, %p143_p8 }
   0xf   : > { %s1348_s28 = smov [#allocation2]   ;;  %s1252_s7 = scalar_lea.hbm %s1645_s2, 3136 }
  0x10   : > { %s1653_s27 = scalar_select %p1427_p10, 1, 0 }
  0x11   : > { %s155_s29 = sshll.u32 %s1348_s28, 4  ;;  %p1125_p11 = pneg %p1427_p10  ;;  %s156_s29 = int_to_ptr.vmem [resolvable:$true] %s155_s29 }
  0x12   : > { %p1253_p13 = scmp.ne.s32.totalorder %s1645_s2, %s1252_s7  ;;  %p1259_p3 = scmp.lt.u32.totalorder %s1252_s7, %s1645_s2 }
  0x13   : > { %p1435_p12 = pnand %p1648_p9, %p1125_p11 }
  0x15   : > { %p1254_p0 = pneg %p1435_p12 }
  0x17   : > { %p1255_p1 = pnand %p1254_p0, %p1253_p13 }
  0x19   : > { %p1256_p2 = pneg %p1255_p1 }
  0x1b   : > { %p1261_p4 = pnand %p1259_p3, %p1256_p2 }
  0x1d   : > { %1264 = shalt.err (!%p1261_p4)
}
  0x1e   : > { %s1265_s12 = scalar_lea.vmem %s156_s29, 3136  ;;  %p1273_p9 = scmp.lt.s32.totalorder %s156_s29, %s156_s29 }
  0x1f   : > { %p1266_p7 = scmp.ne.s32.totalorder %s156_s29, %s1265_s12  ;;  %p1274_p6 = scmp.lt.s32.totalorder %s1265_s12, %s1265_s12 }
  0x21   : > { %p1268_p8 = pnand %p1266_p7, %p1254_p0  ;;  %p1275_p5 = por %p1274_p6, %p1273_p9 }
  0x23   : > { %p1269_p11 = pneg %p1268_p8 }
  0x25   : > { %p1276_p10 = pnand %p1275_p5, %p1269_p11 }
  0x27   : > { %1279 = shalt.err (!%p1276_p10)
}
  0x28   : > { %s1349_s13 = smov 64   ;;  %s1350_s14 = smov 4  }
  0x29   : > { %1128 = dma.hbm_to_vmem [thread:$0]  (!%p1435_p12), %s1645_s2, 3136, %s156_s29, [#allocation3], %s1349_s13, %s1349_s13, %s1350_s14  }
  0x2a   : > { %p1655_p13 = scmp.ne.s32.totalorder %s1653_s27, 0 }
  0x2b   : > { %p1656_p1 = scmp.eq.s32.totalorder (!%p1655_p13), %s1399_s19, 0 }
  0x2c   : > { %192 = sbr.rel (%p1655_p13) target bundleno = 1075 (0x433), region = 36 }
  0x33   : > { %1325 = dma.done.wait (%p1656_p1), [#allocation3], 3136   ;;  %p1657_p0 = pmov %p1656_p1 }
  0x34   : > { %s987_s23 = sshll.u32 %s1399_s19, 2  ;;  %v1172_v0 = vld [vmem:[#allocation2] sm:$0xff]   ;;  %v1173_v1 = vld [vmem:[#allocation2 + $0x8] sm:$0xff]   ;;  %v1174_v2 = vld [vmem:[#allocation2 + $0x10] sm:$0xff]   ;;  %v614_v46 = vlaneseq  ;;  %s1351_s11 = smov 127   ;;  %vm731_vm7 = vcmask 7168  }
  0x35   : > { %1327 = vsyncadd (%p1657_p0), [#allocation3], 4294964160  ;;  %p224_p5 = scmp.lt.s32.totalorder %s987_s23, 7  ;;  %1053 = vmatprep.subr.bf16.mxu0 %v1172_v0  ;;  %v1175_v3 = vld [vmem:[#allocation2 + $0x18] sm:$0xff]   ;;  %v1176_v7 = vld [vmem:[#allocation2 + $0x20] sm:$0xff]   ;;  %s1020_s8 = sshll.u32 %s1399_s19, 7 }
  0x36   : > { %1054 = vmatpush3.bf16.msra.mxu0 %v1172_v0  ;;  %v1180_v8 = vld [vmem:[#allocation2 + $0x40] sm:$0xff]   ;;  %v1181_v9 = vld [vmem:[#allocation2 + $0x48] sm:$0xff]   ;;  %v1182_v10 = vld [vmem:[#allocation2 + $0x50] sm:$0xff]   ;;  %v1495_v52 = vshrl.u32 %v614_v46, 7  ;;  %s1601_s13 = scalar_lea.hbm %s1647_s4, %s1020_s8  ;;  %p1658_p9 = scmp.ne.s32.totalorder %s1651_s25, 0 }
  0x37   : > { %s1665_s23 = smov (!%p224_p5, %s987_s23), 7  ;;  %1055 = vmatprep.subr.bf16.mxu0 %v1173_v1  ;;  %1073 = vmatprep.subr.bf16.mxu1 %v1180_v8  ;;  %v1177_v11 = vld [vmem:[#allocation2 + $0x28] sm:$0xff]   ;;  %v1178_v12 = vld [vmem:[#allocation2 + $0x30] sm:$0xff]   ;;  %v1179_v13 = vld [vmem:[#allocation2 + $0x38] sm:$0xff]   ;;  %s1352_s20 = smov [#allocation5]  }
  0x38   : > { %s988_s28 = sshll.u32 %s1665_s23, 3  ;;  %1074 = vmatpush3.bf16.msra.mxu1 %v1180_v8  ;;  %v1183_v17 = vld [vmem:[#allocation2 + $0x58] sm:$0xff]   ;;  %v1184_v18 = vld [vmem:[#allocation2 + $0x60] sm:$0xff]   ;;  %v1185_v19 = vld [vmem:[#allocation2 + $0x68] sm:$0xff]   ;;  %v641_v58 = vsub.s32 1, %v1495_v52  ;;  %s220_s23 = sand.u32 1, %s1338_s16  }
  0x39   : > { %s1470_s30 = scalar_lea.vmem %s1643_s0, %s988_s28  ;;  %1075 = vmatprep.subr.bf16.mxu1 %v1181_v9  ;;  %v1186_v20 = vld [vmem:[#allocation2 + $0x70] sm:$0xff]   ;;  %v1187_v21 = vld [vmem:[#allocation2 + $0x78] sm:$0xff]   ;;  %v1188_v22 = vld [vmem:[#allocation2 + $0x80] sm:$0xff]   ;;  %s1555_s14 = scalar_lea.vmem %s1644_s1, %s988_s28  ;;  %vm880_vm12 = vcmp.eq.s32.totalorder %v1495_v52, 0 }
  0x3a   : > { %1056 = vmatpush3.bf16.msra.mxu0 %v1173_v1  ;;  %v236_v4 = vld [vmem:[%s1470_s30] sm:$0xff]  ;;  %v237_v5 = vld [vmem:[%s1470_s30 + $0x8] sm:$0xff]  ;;  %v238_v14 = vld [vmem:[%s1470_s30 + $0x10] sm:$0xff]  ;;  %v616_v1 = vsub.s32 0, %v1495_v52  ;;  %s986_s28 = sshll.u32 %s220_s23, 3  ;;  %s884_s19 = scalar_lea.sflag [#allocation4], %s220_s23 }
  0x3b   : > { %1057 = vmatprep.subr.bf16.mxu0 %v1174_v2  ;;  %v240_v6 = vpack.c.bf16 %v237_v5, %v236_v4  ;;  %v239_v15 = vld [vmem:[%s1470_s30 + $0x18] sm:$0xff]  ;;  %v1189_v23 = vld [vmem:[#allocation2 + $0x88] sm:$0xff]   ;;  %v1190_v24 = vld [vmem:[#allocation2 + $0x90] sm:$0xff]   ;;  %s222_s9 = scalar_lea.vmem [#allocation5], %s986_s28  ;;  %s1284_s22 = sshll.u32 %s1352_s20, 4  ;;  %s1285_s22 = int_to_ptr.vmem [resolvable:$false] %s1284_s22 }
  0x3c   : > { %1076 = vmatpush3.bf16.msra.mxu1 %v1181_v9  ;;  %v241_v16 = vpack.c.bf16 %v239_v15, %v238_v14  ;;  %v991_v25 = vld [vmem:[%s1646_s3] ss:$0 sm:$0xff]  ;;  %v1191_v40 = vld [vmem:[#allocation2 + $0x98] sm:$0xff]   ;;  %v1193_v42 = vld [vmem:[#allocation2 + $0xa8] sm:$0xff]   ;;  %s897_s10 = sshll.u32 %s222_s9, 4  ;;  %s1286_s28 = scalar_lea.vmem %s1285_s22, 256  ;;  %s1603_s10 = int_to_ptr.vmem [resolvable:$true] %s897_s10 }
  0x3d   : > { %1069 = vmatprep.mubr.bf16.mxu0 %v240_v6  ;;  %1077 = vmatprep.subr.bf16.mxu1 %v1182_v10  ;;  %v1192_v41 = vld [vmem:[#allocation2 + $0xa0] sm:$0xff]   ;;  %v1194_v43 = vld [vmem:[#allocation2 + $0xb0] sm:$0xff]   ;;  %v1195_v44 = vld [vmem:[#allocation2 + $0xb8] sm:$0xff]   ;;  %p1287_p2 = scmp.lt.s32.totalorder %s1603_s10, %s1285_s22 }
  0x3e   : > { %1058 = vmatpush3.bf16.msra.mxu0 %v1174_v2  ;;  %v1000_v45 = vld [vmem:[%s1646_s3 + $0x1] ss:$0 sm:$0xff]  ;;  %v612_v55 = vld [vmem:[#allocation2 + $0xc0] sm:$0x1] }
  0x3f   : > { %1059 = vmatprep.subr.bf16.mxu0 %v1175_v3  ;;  %v613_v57 = vunpack.c.l.bf16 %v612_v55 }
  0x40   : > { %1078 = vmatpush3.bf16.msra.mxu1 %v1182_v10 }
  0x41   : > { %1079 = vmatprep.subr.bf16.mxu1 %v1183_v17  ;;  %v642_v59 = vrot.slane %v613_v57, %v641_v58 }
  0x42   : > { %1060 = vmatpush3.bf16.msra.mxu0 %v1175_v3 }
  0x43   : > { %1061 = vmatprep.subr.bf16.mxu0 %v1176_v7 }
  0x44   : > { %1080 = vmatpush3.bf16.msra.mxu1 %v1183_v17 }
  0x45   : > { %1081 = vmatprep.subr.bf16.mxu1 %v1184_v18 }
  0x46   : > { %1062 = vmatpush3.bf16.msra.mxu0 %v1176_v7  ;;  %v617_v7 = vrot.slane %v613_v57, %v616_v1 }
  0x47   : > { %1063 = vmatprep.subr.bf16.mxu0 %v1177_v11 }
  0x48   : > { %1082 = vmatpush3.bf16.msra.mxu1 %v1184_v18 }
  0x49   : > { %1083 = vmatprep.subr.bf16.mxu1 %v1185_v19 }
  0x4a   : > { %1064 = vmatpush3.bf16.msra.mxu0 %v1177_v11 }
  0x4b   : > { %1065 = vmatprep.subr.bf16.mxu0 %v1178_v12 }
  0x4c   : > { %1084 = vmatpush3.bf16.msra.mxu1 %v1185_v19 }
  0x4d   : > { %1085 = vmatprep.subr.bf16.mxu1 %v1186_v20 }
  0x4e   : > { %1066 = vmatpush3.bf16.msra.mxu0 %v1178_v12  ;;  %v1018_v12 = vld [vmem:[%s1646_s3 + $0x3] ss:$0 sm:$0xff] }
  0x4f   : > { %1067 = vmatprep.subr.bf16.mxu0 %v1179_v13 }
  0x50   : > { %1086 = vmatpush3.bf16.msra.mxu1 %v1186_v20 }
  0x51   : > { %1087 = vmatprep.subr.bf16.mxu1 %v1187_v21 }
  0x52   : > { %1068 = vmatpush3.bf16.msra.mxu0 %v1179_v13 }
  0x53   : > { %1093 = vmatprep.subr.bf16.mxu0 %v1188_v22 }
  0x54   : > { %1088 = vmatpush3.bf16.msra.mxu1 %v1187_v21 }
  0x55   : > { %1070 = vmatmul.mubr.bf16.vlgmr.msra.gmra.mrb[0].mxu0 %v241_v16 }
  0x56   : > { %1094 = vmatpush3.bf16.msra.mxu0 %v1188_v22 }
  0x57   : > { %1095 = vmatprep.subr.bf16.mxu0 %v1189_v23 }
  0x5a   : > { %1096 = vmatpush3.bf16.msra.mxu0 %v1189_v23 }
  0x5b   : > { %1097 = vmatprep.subr.bf16.mxu0 %v1190_v24 }
  0x5e   : > { %1098 = vmatpush3.bf16.msra.mxu0 %v1190_v24 }
  0x5f   : > { %1099 = vmatprep.subr.bf16.mxu0 %v1191_v40 }
  0x62   : > { %1100 = vmatpush3.bf16.msra.mxu0 %v1191_v40 }
  0x63   : > { %1101 = vmatprep.subr.bf16.mxu0 %v1192_v41 }
  0x66   : > { %1102 = vmatpush3.bf16.msra.mxu0 %v1192_v41 }
  0x67   : > { %1103 = vmatprep.subr.bf16.mxu0 %v1193_v42 }
  0x6a   : > { %1104 = vmatpush3.bf16.msra.mxu0 %v1193_v42 }
  0x6b   : > { %1105 = vmatprep.subr.bf16.mxu0 %v1194_v43 }
  0x6e   : > { %1106 = vmatpush3.bf16.msra.mxu0 %v1194_v43 }
  0x6f   : > { %1107 = vmatprep.subr.bf16.mxu0 %v1195_v44 }
  0x72   : > { %1108 = vmatpush3.bf16.msra.mxu0 %v1195_v44 }
 0x128   : > { %v1071_v26 = vpop.f32.mrb[0].mxu0 }
 0x129   : > { %v345_v27 = vpop.f32.mrb[1].mxu0  ;;  %v354_v30 = vadd.f32 %v1071_v26, %v991_v25 }
 0x12a   : > { %v346_v28 = vadd.f32 %v991_v25, %v345_v27  ;;  %v1072_v29 = vpop.f32.mrb[2].mxu0 }
 0x12b   : > { %v357_v31 = vadd.f32 %v1072_v29, %v991_v25  ;;  %v348_v32 = vpop.f32.mrb[3].mxu0 }
 0x12c   : > { %1196 = vtanh.f32 %v346_v28  ;;  %v349_v33 = vadd.f32 %v991_v25, %v348_v32 }
 0x12d   : > { %1198 = vtanh.f32 %v357_v31 }
 0x12e   : > { %1200 = vtanh.f32 %v349_v33 }
 0x12f   : > { %1202 = vtanh.f32 %v354_v30 }
 0x136   : > { %v1479_v34 = vpop.eup %1196 }
 0x137   : > { %v1481_v35 = vpop.eup %1198 }
 0x138   : > { %v1483_v36 = vpop.eup %1200 }
 0x139   : > { %v1485_v37 = vpop.eup %1202  ;;  %v364_v38 = vpack.c.bf16 %v1483_v36, %v1479_v34 }
 0x13a   : > { %v365_v39 = vpack.c.bf16 %v1481_v35, %v1485_v37 }
 0x13b   : > { %1089 = vmatprep.mubr.bf16.mxu1 %v364_v38 }
 0x13c   : > { %1090 = vmatmul.mubr.bf16.vlgmr.msra.gmra.mrb[0].mxu1 %v365_v39 }
 0x20f   : > { %v1091_v47 = vpop.f32.mrb[0].mxu1 }
 0x210   : > { %v478_v48 = vadd.f32 %v1091_v47, %v1000_v45  ;;  %v469_v49 = vpop.f32.mrb[1].mxu1 }
 0x211   : > { %v470_v50 = vadd.f32 %v1000_v45, %v469_v49  ;;  %v1092_v51 = vpop.f32.mrb[2].mxu1 }
 0x212   : > { %1204 = vtanh.f32 %v478_v48  ;;  %v481_v53 = vadd.f32 %v1092_v51, %v1000_v45  ;;  %v472_v54 = vpop.f32.mrb[3].mxu1 }
 0x213   : > { %1206 = vtanh.f32 %v470_v50  ;;  %v473_v56 = vadd.f32 %v1000_v45, %v472_v54 }
 0x214   : > { %1208 = vtanh.f32 %v481_v53 }
 0x215   : > { %1210 = vtanh.f32 %v473_v56 }
 0x21c   : > { %v1205_v60 = vpop.eup %1204 }
 0x21d   : > { %v1207_v61 = vpop.eup %1206  ;;  %v645_v62 = vmul.f32 %v1205_v60, %v642_v59  ;;  %v620_v11 = vmul.f32 %v1205_v60, %v617_v7 }
 0x21e   : > { %v1209_v63 = vpop.eup %1208  ;;  %v643_v0 = vmul.f32 %v1207_v61, %v642_v59  ;;  %v618_v9 = vmul.f32 %v1207_v61, %v617_v7 }
 0x21f   : > { %v1211_v2 = vpop.eup %1210  ;;  %651 = vadd.xlane.f32.xlu1 %v645_v62  ;;  %v489_v3 = vpack.c.bf16 %v1209_v63, %v1205_v60  ;;  %v646_v5 = vmul.f32 %v1209_v63, %v642_v59  ;;  %v621_v10 = vmul.f32 %v1209_v63, %v617_v7 }
 0x220   : > { %647 = vadd.xlane.f32.xlu0 %v643_v0  ;;  %v488_v4 = vpack.c.bf16 %v1211_v2, %v1207_v61  ;;  %v644_v6 = vmul.f32 %v1211_v2, %v642_v59  ;;  %v619_v8 = vmul.f32 %v1211_v2, %v617_v7 }
 0x222   : > { %1109 = vmatprep.mubr.bf16.mxu0 %v488_v4 }
 0x223   : > { %653 = vadd.xlane.f32.xlu1 %v646_v5  ;;  %1110 = vmatmul.mubr.bf16.vlgmr.msra.gmra.mrb[4].mxu0 %v489_v3 }
 0x224   : > { %649 = vadd.xlane.f32.xlu0 %v644_v6 }
 0x227   : > { %624 = vadd.xlane.f32.xlu1 %v619_v8 }
 0x228   : > { %622 = vadd.xlane.f32.xlu0 %v618_v9 }
 0x22b   : > { %628 = vadd.xlane.f32.xlu1 %v621_v10 }
 0x22c   : > { %626 = vadd.xlane.f32.xlu0 %v620_v11 }
 0x2ac   : > { %v652_v13 = vpop.xlane.xlu1 %651 }
 0x2ad   : > { %v1502_v14 = vadd.f32 %v1018_v12, %v652_v13  ;;  %v648_v15 = vpop.xlane.xlu0 %647 }
 0x2ae   : > { %v1504_v16 = vadd.f32 %v1018_v12, %v648_v15 }
 0x2af   : > { %v758_v17 = vand.u32 2147483647, %v1502_v14  ;;  %v750_v7 = vsub.f32 0.0, %v1502_v14 }
 0x2b0   : > { %v756_v18 = vand.u32 2147483647, %v1504_v16  ;;  %v654_v19 = vpop.xlane.xlu1 %653  ;;  %v748_v8 = vsub.f32 0.0, %v1504_v16 }
 0x2b1   : > { %v762_v20 = vsub.f32 0.0, %v758_v17  ;;  %v1508_v21 = vadd.f32 %v1018_v12, %v654_v19  ;;  %v650_v22 = vpop.xlane.xlu0 %649 }
 0x2b2   : > { %v760_v23 = vsub.f32 0.0, %v756_v18  ;;  %v1510_v24 = vadd.f32 %v1018_v12, %v650_v22  ;;  %v754_v22 = vmax.f32 %v750_v7, 0.0 }
 0x2b3   : > { %v768_v25 = vmul.f32 1.442695, %v762_v20  ;;  %v759_v26 = vand.u32 2147483647, %v1508_v21 }
 0x2b4   : > { %v764_v27 = vmul.f32 1.442695, %v760_v23  ;;  %v757_v28 = vand.u32 2147483647, %v1510_v24  ;;  %v625_v29 = vpop.xlane.xlu1 %624  ;;  %v752_v23 = vmax.f32 %v748_v8, 0.0  ;;  %v749_v14 = vsub.f32 0.0, %v1510_v24 }
 0x2b5   : > { %1212 = vpow2.f32 %v768_v25  ;;  %v763_v30 = vsub.f32 0.0, %v759_v26  ;;  %v1514_v31 = vadd.f32 %v1018_v12, %v625_v29  ;;  %v623_v32 = vpop.xlane.xlu0 %622 }
 0x2b6   : > { %1214 = vpow2.f32 %v764_v27  ;;  %v761_v33 = vsub.f32 0.0, %v757_v28  ;;  %v1516_v38 = vadd.f32 %v1018_v12, %v623_v32 }
 0x2b7   : > { %v770_v39 = vmul.f32 1.442695, %v763_v30  ;;  %v676_v40 = vand.u32 2147483647, %v1514_v31 }
 0x2b8   : > { %v766_v41 = vmul.f32 1.442695, %v761_v33  ;;  %v675_v42 = vand.u32 2147483647, %v1516_v38  ;;  %v629_v43 = vpop.xlane.xlu1 %628 }
 0x2b9   : > { %1216 = vpow2.f32 %v770_v39  ;;  %v680_v44 = vsub.f32 0.0, %v676_v40  ;;  %v1520_v45 = vadd.f32 %v1018_v12, %v629_v43  ;;  %v627_v47 = vpop.xlane.xlu0 %626 }
 0x2ba   : > { %1218 = vpow2.f32 %v766_v41  ;;  %v679_v48 = vsub.f32 0.0, %v675_v42  ;;  %v1522_v49 = vadd.f32 %v1018_v12, %v627_v47 }
 0x2bb   : > { %v685_v50 = vmul.f32 1.442695, %v680_v44  ;;  %v678_v51 = vand.u32 2147483647, %v1520_v45 }
 0x2bc   : > { %v683_v53 = vmul.f32 1.442695, %v679_v48  ;;  %v677_v54 = vand.u32 2147483647, %v1522_v49 }
 0x2bd   : > { %v682_v55 = vsub.f32 0.0, %v678_v51  ;;  %1220 = vpow2.f32 %v685_v50 }
 0x2be   : > { %v681_v56 = vsub.f32 0.0, %v677_v54  ;;  %1222 = vpow2.f32 %v683_v53  ;;  %v751_v53 = vsub.f32 0.0, %v1508_v21  ;;  %v753_v54 = vmax.f32 %v749_v14, 0.0 }
 0x2bf   : > { %v1213_v57 = vpop.eup %1212  ;;  %v689_v61 = vmul.f32 1.442695, %v682_v55 }
 0x2c0   : > { %v1215_v58 = vpop.eup %1214  ;;  %v687_v59 = vmul.f32 1.442695, %v681_v56  ;;  %v790_v60 = vadd.f32 1.0, %v1213_v57  ;;  %v793_v3 = vmul.f32 -0.5, %v1213_v57  ;;  %v796_v11 = vand.u32 2147483647, %v1213_v57 }
 0x2c1   : > { %v772_v62 = vadd.f32 1.0, %v1215_v58  ;;  %v775_v4 = vmul.f32 -0.5, %v1215_v58  ;;  %v778_v17 = vand.u32 2147483647, %v1215_v58 }
 0x2c2   : > { %1224 = vpow2.f32 %v687_v59  ;;  %v794_v10 = vadd.f32 1.0, %v793_v3  ;;  %vm797_vm0 = vcmp.lt.f32.partialorder %v796_v11, 0.0004427343  ;;  %v659_v3 = vld [vmem:[%s1555_s14] sm:$0xff] }
 0x2c3   : > { %v1526_v63 = vpop.eup %1216  ;;  %1226 = vlog2.f32 %v790_v60  ;;  %v776_v12 = vadd.f32 1.0, %v775_v4  ;;  %vm779_vm1 = vcmp.lt.f32.partialorder %v778_v17, 0.0004427343  ;;  %v755_v60 = vmax.f32 %v751_v53, 0.0 }
 0x2c4   : > { %v1219_v0 = vpop.eup %1218  ;;  %1228 = vlog2.f32 %v772_v62  ;;  %v799_v1 = vadd.f32 1.0, %v1526_v63  ;;  %v802_v18 = vmul.f32 -0.5, %v1526_v63  ;;  %v795_v27 = vmul.f32 %v1213_v57, %v794_v10 }
 0x2c5   : > { %1230 = vpow2.f32 %v689_v61  ;;  %v781_v2 = vadd.f32 1.0, %v1219_v0  ;;  %v784_v9 = vmul.f32 -0.5, %v1219_v0  ;;  %v777_v32 = vmul.f32 %v1215_v58, %v776_v12 }
 0x2c6   : > { %1232 = vlog2.f32 %v799_v1  ;;  %v787_v33 = vand.u32 2147483647, %v1219_v0  ;;  %v803_v41 = vadd.f32 1.0, %v802_v18  ;;  %v805_v47 = vand.u32 2147483647, %v1526_v63 }
 0x2c7   : > { %1234 = vlog2.f32 %v781_v2  ;;  %v1529_v5 = vpop.eup %1220  ;;  %v785_v25 = vadd.f32 1.0, %v784_v9  ;;  %v660_v2 = vld [vmem:[%s1555_s14 + $0x8] sm:$0xff]  ;;  %v661_v9 = vld [vmem:[%s1555_s14 + $0x10] sm:$0xff]  ;;  %v664_v12 = vmax.f32 %v1514_v31, 0.0 }
 0x2c8   : > { %v1531_v6 = vpop.eup %1222  ;;  %v700_v13 = vadd.f32 1.0, %v1529_v5  ;;  %vm788_vm2 = vcmp.lt.f32.partialorder %v787_v33, 0.0004427343  ;;  %v804_v56 = vmul.f32 %v1526_v63, %v803_v41  ;;  %vm806_vm3 = vcmp.lt.f32.partialorder %v805_v47, 0.0004427343 }
 0x2c9   : > { %v691_v19 = vadd.f32 1.0, %v1531_v6  ;;  %v786_v44 = vmul.f32 %v1219_v0, %v785_v25  ;;  %v694_v61 = vmul.f32 -0.5, %v1531_v6  ;;  %v703_v21 = vmul.f32 -0.5, %v1529_v5 }
 0x2ca   : > { %1236 = vlog2.f32 %v700_v13  ;;  %v697_v10 = vand.u32 2147483647, %v1531_v6  ;;  %v706_v11 = vand.u32 2147483647, %v1529_v5 }
 0x2cb   : > { %1238 = vlog2.f32 %v691_v19  ;;  %v695_v4 = vadd.f32 1.0, %v694_v61  ;;  %v704_v7 = vadd.f32 1.0, %v703_v21  ;;  %v668_v19 = vmul.f32 %v660_v2, %v1514_v31 }
 0x2cc   : > { %v1536_v15 = vpop.eup %1224  ;;  %vm698_vm4 = vcmp.lt.f32.partialorder %v697_v10, 0.0004427343  ;;  %vm707_vm5 = vcmp.lt.f32.partialorder %v706_v11, 0.0004427343 }
 0x2cd   : > { %v1227_v20 = vpop.eup %1226  ;;  %v709_v28 = vadd.f32 1.0, %v1536_v15  ;;  %v712_v0 = vmul.f32 -0.5, %v1536_v15  ;;  %v696_v14 = vmul.f32 %v1531_v6, %v695_v4  ;;  %v705_v25 = vmul.f32 %v1529_v5, %v704_v7  ;;  %v662_v6 = vld [vmem:[%s1555_s14 + $0x18] sm:$0xff]  ;;  %s1280_s14 = scalar_lea.vmem %s1603_s10, 128 }
 0x2ce   : > { %v1229_v16 = vpop.eup %1228  ;;  %v792_v26 = vmul.f32 0.6931472, %v1227_v20  ;;  %v663_v20 = vmax.f32 %v1516_v38, 0.0  ;;  %v672_v33 = vsub.f32 %v664_v12, %v668_v19  ;;  %v670_v47 = vmul.f32 %v662_v6, %v1520_v45  ;;  %p1281_p6 = scmp.ne.s32.totalorder %s1603_s10, %s1280_s14  ;;  %p1288_p3 = scmp.lt.s32.totalorder %s1286_s28, %s1280_s14 }
 0x2cf   : > { %v1542_v29 = vpop.eup %1230  ;;  %v774_v30 = vmul.f32 0.6931472, %v1229_v16  ;;  %1240 = vlog2.f32 %v709_v28  ;;  %v713_v18 = vadd.f32 1.0, %v712_v0  ;;  %v669_v28 = vmul.f32 %v661_v9, %v1522_v49 }
 0x2d0   : > { %v1233_v39 = vpop.eup %1232  ;;  %v798_v40 = vsel %vm797_vm0, %v795_v27, %v792_v26  ;;  %v718_v57 = vadd.f32 1.0, %v1542_v29  ;;  %v721_v26 = vmul.f32 -0.5, %v1542_v29  ;;  %v665_v27 = vmax.f32 %v1522_v49, 0.0  ;;  %p1282_p10 = pnand %p1281_p6, %p1658_p9  ;;  %p1289_p4 = por %p1288_p3, %p1287_p2 }
 0x2d1   : > { %v1235_v42 = vpop.eup %1234  ;;  %v810_v24 = vadd.f32 %v798_v40, %v754_v22  ;;  %v780_v43 = vsel %vm779_vm1, %v777_v32, %v774_v30  ;;  %v801_v51 = vmul.f32 0.6931472, %v1233_v39  ;;  %v667_v22 = vmul.f32 %v659_v3, %v1516_v38 }
 0x2d2   : > { %v808_v48 = vadd.f32 %v780_v43, %v752_v23  ;;  %v783_v50 = vmul.f32 0.6931472, %v1235_v42  ;;  %1242 = vlog2.f32 %v718_v57  ;;  %v715_v23 = vand.u32 2147483647, %v1536_v15  ;;  %p1283_p12 = pneg %p1282_p10 }
 0x2d3   : > { %820 = vrot.lane.b32.xlu1 %v810_v24, %s1351_s11  ;;  %v807_v59 = vsel %vm806_vm3, %v804_v56, %v801_v51  ;;  %v714_v38 = vmul.f32 %v1536_v15, %v713_v18  ;;  %v671_v39 = vsub.f32 %v663_v20, %v667_v22  ;;  %v722_v5 = vadd.f32 1.0, %v721_v26 }
 0x2d4   : > { %816 = vrot.lane.b32.xlu0 %v808_v48, %s1351_s11  ;;  %v789_v55 = vsel %vm788_vm2, %v786_v44, %v783_v50  ;;  %v1237_v62 = vpop.eup %1236  ;;  %v811_v63 = vadd.f32 %v807_v59, %v755_v60  ;;  %vm716_vm6 = vcmp.lt.f32.partialorder %v715_v23, 0.0004427343  ;;  %v673_v41 = vsub.f32 %v665_v27, %v669_v28  ;;  %p1290_p7 = pnand %p1289_p4, %p1283_p12 }
 0x2d5   : > { %v809_v58 = vadd.f32 %v789_v55, %v753_v54  ;;  %v1239_v1 = vpop.eup %1238  ;;  %v702_v17 = vmul.f32 0.6931472, %v1237_v62  ;;  %v724_v42 = vand.u32 2147483647, %v1542_v29  ;;  %v666_v49 = vmax.f32 %v1520_v45, 0.0 }
 0x2d6   : > { %v693_v13 = vmul.f32 0.6931472, %v1239_v1  ;;  %v723_v15 = vmul.f32 %v1542_v29, %v722_v5  ;;  %v1009_v45 = vld [vmem:[%s1646_s3 + $0x2] ss:$0 sm:$0xff] }
 0x2d7   : > { %818 = vrot.lane.b32.xlu1 %v809_v58, %s1351_s11  ;;  %v708_v30 = vsel %vm707_vm5, %v705_v25, %v702_v17  ;;  %vm725_vm8 = vcmp.lt.f32.partialorder %v724_v42, 0.0004427343  ;;  %v674_v54 = vsub.f32 %v666_v49, %v670_v47 }
 0x2d8   : > { %v699_v31 = vsel %vm698_vm4, %v696_v14, %v693_v13  ;;  %v728_v43 = vadd.f32 %v708_v30, %v672_v33 }
 0x2d9   : > { %v1241_v8 = vpop.eup %1240  ;;  %v727_v24 = vadd.f32 %v699_v31, %v671_v39 }
 0x2da   : > { %v711_v16 = vmul.f32 0.6931472, %v1241_v8  ;;  %v733_v51 = vsel %vm731_vm7, %v728_v43, 0.0 }
 0x2db   : > { %822 = vrot.lane.b32.xlu1 %v811_v63, %s1351_s11  ;;  %v732_v50 = vsel %vm731_vm7, %v727_v24, 0.0 }
 0x2dc   : > { %v1243_v32 = vpop.eup %1242  ;;  %v717_v40 = vsel %vm716_vm6, %v714_v38, %v711_v16  ;;  %v734_v56 = vadd.f32 %v733_v51, %v732_v50 }
 0x2dd   : > { %v720_v44 = vmul.f32 0.6931472, %v1243_v32  ;;  %v729_v48 = vadd.f32 %v717_v40, %v673_v41 }
 0x2df   : > { %v726_v53 = vsel %vm725_vm8, %v723_v15, %v720_v44  ;;  %v735_v55 = vsel %vm731_vm7, %v729_v48, 0.0 }
 0x2e0   : > { %v730_v57 = vadd.f32 %v726_v53, %v674_v54  ;;  %v736_v58 = vadd.f32 %v735_v55, %v734_v56  ;;  %v865_v55 = vand.u32 127, %v614_v46 }
 0x2e2   : > { %v737_v59 = vsel %vm731_vm7, %v730_v57, 0.0  ;;  %vm872_vm9 = vcmp.eq.s32.totalorder %v865_v55, 2  ;;  %vm870_vm10 = vcmp.eq.s32.totalorder %v865_v55, 1  ;;  %vm868_vm11 = vcmp.eq.s32.totalorder %v865_v55, 0 }
 0x2e3   : > { %v738_v60 = vadd.f32 %v737_v59, %v736_v58 }
 0x2f3   : > { %739 = vadd.xlane.f32.xlu0 %v738_v60 }
 0x2f6   : > { %v1111_v29 = vpop.f32.mrb[4].mxu0 }
 0x2f7   : > { %v602_v61 = vadd.f32 %v1111_v29, %v1009_v45  ;;  %v593_v21 = vpop.f32.mrb[5].mxu0 }
 0x2f8   : > { %v594_v62 = vadd.f32 %v1009_v45, %v593_v21  ;;  %v1112_v63 = vpop.f32.mrb[6].mxu0 }
 0x2f9   : > { %1244 = vtanh.f32 %v602_v61  ;;  %v605_v0 = vadd.f32 %v1112_v63, %v1009_v45  ;;  %v596_v1 = vpop.f32.mrb[7].mxu0 }
 0x2fa   : > { %1246 = vtanh.f32 %v594_v62  ;;  %v597_v2 = vadd.f32 %v1009_v45, %v596_v1 }
 0x2fb   : > { %1248 = vtanh.f32 %v605_v0 }
 0x2fc   : > { %1250 = vtanh.f32 %v597_v2 }
 0x303   : > { %v1245_v3 = vpop.eup %1244 }
 0x304   : > { %v1247_v4 = vpop.eup %1246  ;;  %v846_v11 = vsub.f32 %v1245_v3, %v1485_v37 }
 0x305   : > { %v1249_v7 = vpop.eup %1248  ;;  %v844_v8 = vsub.f32 %v1247_v4, %v1479_v34 }
 0x306   : > { %v1251_v9 = vpop.eup %1250  ;;  %v847_v12 = vsub.f32 %v1249_v7, %v1481_v35  ;;  %v850_v18 = vand.u32 2147483647, %v846_v11 }
 0x307   : > { %v845_v10 = vsub.f32 %v1251_v9, %v1483_v36  ;;  %v848_v13 = vand.u32 2147483647, %v844_v8 }
 0x308   : > { %v851_v20 = vand.u32 2147483647, %v847_v12 }
 0x309   : > { %v849_v17 = vand.u32 2147483647, %v845_v10 }
 0x30b   : > { %v852_v19 = vadd.f32 %v849_v17, %v848_v13 }
 0x30d   : > { %v853_v22 = vadd.f32 %v852_v19, %v850_v18 }
 0x30f   : > { %v854_v23 = vadd.f32 %v853_v22, %v851_v20 }
 0x311   : > { %855 = vadd.xlane.f32.xlu0 %v854_v23 }
 0x345   : > { %v821_v14 = vpop.permute.xlu1 %820 }
 0x346   : > { %v817_v25 = vpop.permute.xlu0 %816  ;;  %v831_v37 = vsel %vm731_vm7, %v821_v14, 0.0 }
 0x347   : > { %v828_v34 = vsel %vm731_vm7, %v817_v25, 0.0 }
 0x349   : > { %v819_v16 = vpop.permute.xlu1 %818 }
 0x34a   : > { %v829_v26 = vsel %vm731_vm7, %v819_v16, 0.0 }
 0x34b   : > { %v830_v36 = vadd.f32 %v829_v26, %v828_v34 }
 0x34d   : > { %v823_v27 = vpop.permute.xlu1 %822  ;;  %v832_v35 = vadd.f32 %v831_v37, %v830_v36 }
 0x34e   : > { %v833_v28 = vsel %vm731_vm7, %v823_v27, 0.0 }
 0x34f   : > { %v834_v31 = vadd.f32 %v833_v28, %v832_v35 }
 0x351   : > { %835 = vadd.xlane.f32.xlu1 %v834_v31 }
 0x380   : > { %v740_v30 = vpop.xlane.xlu0 %739 }
 0x381   : > { %v741_v38 = vrot.slane %v740_v30, 4 }
 0x383   : > { %v742_v32 = vadd.f32 %v741_v38, %v740_v30 }
 0x385   : > { %v743_v33 = vrot.slane %v742_v32, 2 }
 0x387   : > { %v744_v39 = vadd.f32 %v743_v33, %v742_v32 }
 0x389   : > { %v745_v6 = vrot.slane %v744_v39, 1 }
 0x38b   : > { %v746_v40 = vadd.f32 %v745_v6, %v744_v39 }
 0x38d   : > { %1113 = vpush %v746_v40 }
 0x39e   : > { %v856_v5 = vpop.xlane.xlu0 %855 }
 0x39f   : > { %v857_v41 = vrot.slane %v856_v5, 4 }
 0x3a1   : > { %v858_v42 = vadd.f32 %v857_v41, %v856_v5 }
 0x3a3   : > { %v859_v24 = vrot.slane %v858_v42, 2 }
 0x3a5   : > { %v860_v47 = vadd.f32 %v859_v24, %v858_v42 }
 0x3a7   : > { %v861_v50 = vrot.slane %v860_v47, 1 }
 0x3a9   : > { %v862_v54 = vadd.f32 %v861_v50, %v860_v47 }
 0x3be   : > { %s1114_s27 = spop %1113 }
 0x3bf   : > { %s869_s29 = smul.f32 0.015625, %s1114_s27 }
 0x3c1   : > { %v878_v59 = vstv %s869_s29 }
 0x3de   : > { %v836_v43 = vpop.xlane.xlu1 %835 }
 0x3df   : > { %v837_v44 = vrot.slane %v836_v43, 4 }
 0x3e1   : > { %v838_v49 = vadd.f32 %v837_v44, %v836_v43 }
 0x3e3   : > { %v839_v48 = vrot.slane %v838_v49, 2 }
 0x3e5   : > { %v840_v15 = vadd.f32 %v839_v48, %v838_v49 }
 0x3e7   : > { %v841_v51 = vrot.slane %v840_v15, 1 }
 0x3e9   : > { %v842_v53 = vadd.f32 %v841_v51, %v840_v15 }
 0x3eb   : > { %1115 = vpush %v842_v53 }
 0x3ec   : > { %1117 = vpush %v862_v54 }
 0x41c   : > { %s1116_s30 = spop %1115 }
 0x41d   : > { %s871_s5 = smul.f32 0.015625, %s1116_s30  ;;  %s1118_s6 = spop %1117 }
 0x41e   : > { %s873_s7 = smul.f32 0.00012207031, %s1118_s6 }
 0x41f   : > { %v876_v56 = vstv %s871_s5 }
 0x420   : > { %v874_v57 = vstv %s873_s7 }
 0x421   : > { %v875_v58 = vsel %vm872_vm9, %v874_v57, 0.0 }
 0x422   : > { %v877_v60 = vsel %vm870_vm10, %v876_v56, %v875_v58 }
 0x423   : > { %v879_v46 = vsel %vm868_vm11, %v878_v59, %v877_v60 }
 0x424   : > { %v881_v45 = vsel %vm880_vm12, %v879_v46, 0.0 }
 0x425   : > { %882 = vst [vmem:[%s222_s9] sm:$0xff] %v881_v45 }
 0x426   : > { %1293 = shalt.err (!%p1290_p7)
}
 0x427   : > { %s1294_s23 = scalar_lea.hbm %s1601_s13, 128  ;;  %s1298_s30 = scalar_lea.hbm %s1647_s4, 256 }
 0x428   : > { %p1295_p8 = scmp.ne.s32.totalorder %s1601_s13, %s1294_s23  ;;  %p1299_p1 = scmp.lt.u32.totalorder %s1601_s13, %s1647_s4 }
 0x429   : > { %p1300_p0 = scmp.lt.u32.totalorder %s1298_s30, %s1294_s23  ;;  %p1302_p6 = scmp.lt.u32.totalorder %s1294_s23, %s1601_s13 }
 0x42a   : > { %p1296_p11 = pnand %p1295_p8, %p1658_p9 }
 0x42b   : > { %p1301_p5 = por %p1300_p0, %p1299_p1 }
 0x42c   : > { %p1297_p13 = pneg %p1296_p11 }
 0x42d   : > { %p1303_p10 = por %p1302_p6, %p1301_p5 }
 0x42f   : > { %p1304_p12 = pnand %p1303_p10, %p1297_p13 }
 0x431   : > { %1307 = shalt.err (!%p1304_p12)
}
 0x432   : > { %1123 = dma.vmem_to_hbm [thread:$0]  (%p1658_p9), %s1603_s10, 128, %s1601_s13, %s884_s19  }
 0x433 PF: > { %p1135_p2 = scmp.ge.s32.totalorder %s1346_s18, 2  ;;  %s909_s7 = sand.u32 1, %s1334_s15  }
 0x434   : > { %p1659_p3 = scmp.ne.s32.totalorder %s1652_s26, 0  ;;  %s910_s8 = scalar_lea.sflag [#allocation4], %s909_s7 }
 0x436   : > { %p1130_p4 = pnand %p1135_p2, %p1659_p3 }
 0x438   : > { %1329 = dma.done.wait (!%p1130_p4), %s910_s8, 128  }
 0x439   : > { %1331 = vsyncadd (!%p1130_p4), %s910_s8, 4294967168  ;;  %p15_p7 = scmp.ge.s32.totalorder %s1403_s21, 4   ;;  %s1660_s15 = smov %s1338_s16 }
 0x43a   : > { %s1661_s16 = smov %s1342_s17  ;;  %s1662_s17 = smov %s1414_s24 }
 0x43b   : > { %s1663_s18 = smov %s1403_s21  ;;  %17 = sbr.rel (!%p15_p7) target bundleno = 4 (0x4), region = 79 }
 0x442   :  { %915 = vsyncpa [#allocation3], 1 }
 0x443   :  { %917 = vsyncpa [#allocation3 + $0x1], 1 }
 0x444   :  { %918 = vsyncpa [#allocation4], 1 }
 0x445   :  { %920 = vsyncpa [#allocation4 + $0x1], 1 }

</bundles_post_ra>
